<compile_context>
chip_gen: v7x
topology: tpu7x:2x2x1
jax: 0.10.0
libtpu: 0.0.40
codegen_flags: <defaults>
</compile_context>

<pallas_src>
import functools

import jax
import jax.numpy as jnp
from jax.experimental import pallas as pl
from jax.experimental.pallas import tpu as pltpu


def _msgc_kernel(a_ref, w_ref, o_ref, *, K: int, compute_dtype):
    """One program handles a group of G (b, t) pairs.

    a_ref: (G, N, N)     adjacency slab (HBM dtype, cast in-kernel for the MXU)
    w_ref: (K+1, N, D)   stacked weights; constant index_map -> stays resident
    o_ref: (1, G, N*D)   lane-dense output slab
    """
    G, N, _ = a_ref.shape
    D = w_ref.shape[-1]

    w = w_ref[...]                                   # single hoisted load, f32

    if K == 0:
        y = jnp.broadcast_to(w[0], (G, N, D)).astype(jnp.float32)
    else:
        a = a_ref[...].astype(compute_dtype)         # in-kernel MXU cast (free)
        w_mxu = w.astype(compute_dtype)              # tiny; no-op for f32

        # First Horner step: A @ W_K with the shared RHS as ONE 2D matmul
        # (G*N, N) @ (N, D), f32 accumulation on the MXU.
        y = jnp.dot(a.reshape(G * N, N), w_mxu[K],
                    preferred_element_type=jnp.float32).reshape(G, N, D)
        y = w[K - 1] + y                             # f32 add (broadcast over G)

        # Remaining Horner steps: Y = W_k + A @ Y  =>  Y = sum_k A^k W_k.
        for k in range(K - 2, -1, -1):
            ay = jnp.einsum("gij,gjd->gid", a, y.astype(compute_dtype),
                            preferred_element_type=jnp.float32)
            y = w[k] + ay

    # Lane-dense store: (G, N, D) -> (1, G, N*D); N*D is a multiple of 128 for
    # typical D, giving unmasked full-width vst on the output path.
    o_ref[...] = y.reshape(1, G, N * D).astype(o_ref.dtype)


def _vmem_budget():
    """(block budget, vmem_limit_bytes) picked per TPU generation."""
    cap = None
    try:
        cap = getattr(pltpu.get_tpu_info(), "vmem_capacity_bytes", None)
    except Exception:  # pragma: no cover - info query is best-effort
        cap = None
    if cap is None:
        cap = 64 * 1024 * 1024                      # assume the smallest part
    if cap >= 100 * 1024 * 1024:                    # v5e / v6e: 128 MiB VMEM
        return 48 * 1024 * 1024, 96 * 1024 * 1024
    return 20 * 1024 * 1024, 44 * 1024 * 1024       # v7x: 64 MiB physical


def _pick_group_size(BT, N, D, K, a_itemsize, out_itemsize, budget):
    """How many (b, t) pairs per program, using (8,128)-padded tile sizes."""
    pad8 = lambda v: ((v + 7) // 8) * 8
    pad128 = lambda v: ((v + 127) // 128) * 128
    ND = N * D
    # Double-buffered A block, per (b, t), padded.
    a_per = 2 * pad8(N) * pad128(N) * a_itemsize
    # Double-buffered lane-dense output rows, per (b, t).
    out_per = 2 * pad128(ND) * out_itemsize
    # In-kernel intermediates per (b, t): f32 y, cast copies of A / y fed to the
    # MXU, matmul result and reshape staging.  Generous allowance.
    interm_per = (4 * pad8(N) * pad128(D) * 4
                  + 2 * pad8(N) * pad128(N) * 4
                  + pad128(ND) * 4)
    per_bt = a_per + out_per + interm_per
    # Resident stacked weights (double-buffer worst case) + fixed slack.
    fixed = 2 * (K + 1) * pad8(N) * pad128(D) * 4 + (2 << 20)
    g = (budget - fixed) // per_bt
    return int(max(1, min(BT, g)))


def multi_scale_gc(x, A, weights, *, K: int = 3, compute_dtype=None,
                   out_dtype=jnp.float32, group_size=None):
    """Pallas implementation of MultiScaleGC.forward(x, A).

    x is unused (as in the PyTorch module). A: (B, T, N, N); weights: (K+1, N, D).
    compute_dtype: dtype fed to the MXU (e.g. jnp.bfloat16 on v6e/v7x); the cast
    happens inside the kernel, accumulation is always float32, output dtype is
    `out_dtype`.  Returns (B, T, N, D).
    """
    del x  # unused by the reference forward pass
    B, T, N, N2 = A.shape
    assert N == N2, "A must be square over the node dims"
    Kp1, N_w, D = weights.shape
    assert Kp1 == K + 1 and N_w == N, "weights must be (K+1, N, out_dim) with in_dim == N"

    if compute_dtype is None:
        compute_dtype = A.dtype

    BT = B * T
    ND = N * D
    A_r = A.reshape(BT, N, N)            # free reshape; no dtype cast in wrapper
    W = weights                           # keep f32 weights in HBM (tiny, resident)

    budget, vmem_limit = _vmem_budget()
    if group_size is None:
        G_cap = _pick_group_size(BT, N, D, K,
                                 jnp.dtype(A_r.dtype).itemsize,
                                 jnp.dtype(out_dtype).itemsize, budget)
        # Guarantee >= 4 programs (when BT allows) so both v7x TensorCores get
        # work and double-buffering engages.
        min_progs = 4 if BT >= 4 else max(BT, 1)
        G = max(1, min(G_cap, BT // min_progs)) if BT >= min_progs else 1
    else:
        G = max(1, int(group_size))

    num_groups = -(-BT // G)
    BT_pad = num_groups * G
    if BT_pad != BT:
        # Zero-pad the trailing (b, t) slots; A=0 rows produce dummy output rows
        # that are sliced off below.  Keeps blocks large for awkward/prime BT.
        A_r = jnp.concatenate(
            [A_r, jnp.zeros((BT_pad - BT, N, N), A_r.dtype)], axis=0)

    kernel = functools.partial(_msgc_kernel, K=K, compute_dtype=compute_dtype)

    out = pl.pallas_call(
        kernel,
        out_shape=jax.ShapeDtypeStruct((num_groups, G, ND), out_dtype),
        grid_spec=pltpu.PrefetchScalarGridSpec(
            num_scalar_prefetch=0,
            grid=(num_groups,),
            in_specs=[
                # (G, N, N) adjacency slab per program; trailing dims span the
                # full array dims, so the (8,128) rule is satisfied for any G/N.
                pl.BlockSpec((G, N, N), lambda g: (g, 0, 0)),
                # Full stacked weights; constant index_map -> no re-DMA per step.
                pl.BlockSpec((K + 1, N, D), lambda g: (0, 0, 0)),
            ],
            # Lane-dense output slab: last two block dims (G, N*D) equal the
            # full array dims, and N*D is typically a multiple of 128.
            out_specs=pl.BlockSpec((1, G, ND), lambda g: (g, 0, 0)),
        ),
        compiler_params=pltpu.CompilerParams(
            dimension_semantics=("parallel",),
            vmem_limit_bytes=vmem_limit,
        ),
    )(A_r, W)

    # Row-major (num_groups, G, N*D) == (BT_pad, N, D) == (B, T, N, D): the
    # reshapes below are free relabelings.
    out_flat = out.reshape(BT_pad, N, D)
    if BT_pad != BT:
        out_flat = out_flat[:BT]
    return out_flat.reshape(B, T, N, D)


def multi_scale_gc_ref(x, A, weights, *, K: int = 3):
    """Pure-JAX reference mirroring the PyTorch loop (identity over node dims)."""
    del x
    B, T, N, _ = A.shape
    A_power = jnp.broadcast_to(jnp.eye(N, dtype=A.dtype), (B, T, N, N))
    outputs = []
    for k in range(K + 1):
        h = jnp.einsum("ntij,jd->ntid", A_power, weights[k])
        outputs.append(h)
        A_power = A_power @ A
    return jnp.stack(outputs).sum(0)


if __name__ == "__main__":
    K = 3
    B, T, N, D = 2, 4, 16, 32  # batch, time, nodes (= in_dim), out_dim

    key = jax.random.PRNGKey(0)
    kx, ka, kw = jax.random.split(key, 3)

    # x matches the module's call signature but is unused in forward().
    x = jax.random.normal(kx, (B, 4, N, N), dtype=jnp.float32)
    A = jax.random.normal(ka, (B, T, N, N), dtype=jnp.float32) * 0.1
    weights = jax.random.normal(kw, (K + 1, N, D), dtype=jnp.float32)

    ref = multi_scale_gc_ref(x, A, weights, K=K)

    # Full-precision path: matches the PyTorch module numerics (f32 everywhere).
    out = jax.block_until_ready(multi_scale_gc(x, A, weights, K=K))
    assert out.shape == (B, T, N, D)
    assert jnp.allclose(out, ref, atol=1e-4, rtol=1e-4), "f32 mismatch vs reference"

    # bf16-fed MXU path (cast happens in-kernel); f32 accumulate, f32 output.
    out_bf16 = jax.block_until_ready(
        multi_scale_gc(x, A, weights, K=K, compute_dtype=jnp.bfloat16))
    assert out_bf16.shape == (B, T, N, D)
    assert jnp.allclose(out_bf16, ref, atol=2e-1, rtol=1e-1), "bf16 path diverged"

    print("KERNEL_OK")
</pallas_src>

<mosaic_0001>
module attributes {stable_mosaic.version = 11 : i64} {
  func.func @_msgc_kernel(%arg0: i32, %arg1: memref<2x16x16xf32, #tpu.memory_space<vmem>>, %arg2: memref<4x16x32xf32, #tpu.memory_space<vmem>>, %arg3: memref<1x2x512xf32, #tpu.memory_space<vmem>>) attributes {dimension_semantics = [#tpu.dimension_semantics<parallel>], iteration_bounds = array<i64: 4>, scalar_prefetch = 0 : i64, scratch_operands = 0 : i64, tpu.core_type = #tpu.core_type<tc>, window_params = [{transform_indices = @transform_0, window_bounds = array<i64: 2, 16, 16>}, {pipeline_mode = #tpu.pipeline_mode<synchronous>, transform_indices = @transform_1, window_bounds = array<i64: 4, 16, 32>}, {transform_indices = @transform_2, window_bounds = array<i64: 1, 2, 512>}]} {
    %c0 = arith.constant 0 : index
    %c0_0 = arith.constant 0 : index
    %c0_1 = arith.constant 0 : index
    %0 = vector.load %arg2[%c0, %c0_0, %c0_1] : memref<4x16x32xf32, #tpu.memory_space<vmem>>, vector<4x16x32xf32>
    %c0_2 = arith.constant 0 : index
    %c0_3 = arith.constant 0 : index
    %c0_4 = arith.constant 0 : index
    %1 = vector.load %arg1[%c0_2, %c0_3, %c0_4] : memref<2x16x16xf32, #tpu.memory_space<vmem>>, vector<2x16x16xf32>
    %2 = vector.shape_cast %1 : vector<2x16x16xf32> to vector<32x16xf32>
    %3 = vector.extract_strided_slice %0 {offsets = [3, 0, 0], sizes = [1, 16, 32], strides = [1, 1, 1]} : vector<4x16x32xf32> to vector<1x16x32xf32>
    %4 = vector.shape_cast %3 : vector<1x16x32xf32> to vector<16x32xf32>
    %cst = arith.constant dense<0.000000e+00> : vector<32x32xf32>
    %5 = tpu.matmul %2, %4, %cst {dimension_numbers = #tpu.dot_dimension_numbers<[1], [0], [0], [1], [0, 0, 1, 1], [], []>} : vector<32x16xf32>, vector<16x32xf32>, vector<32x32xf32> -> vector<32x32xf32>
    %6 = vector.shape_cast %5 : vector<32x32xf32> to vector<2x16x32xf32>
    %7 = vector.extract_strided_slice %0 {offsets = [2, 0, 0], sizes = [1, 16, 32], strides = [1, 1, 1]} : vector<4x16x32xf32> to vector<1x16x32xf32>
    %8 = vector.shape_cast %7 : vector<1x16x32xf32> to vector<16x32xf32>
    %9 = vector.shape_cast %8 : vector<16x32xf32> to vector<1x16x32xf32>
    %10 = vector.broadcast %9 : vector<1x16x32xf32> to vector<2x16x32xf32>
    %11 = arith.addf %10, %6 : vector<2x16x32xf32>
    "tpu.trace_start"() <{level = 10 : i32, message = "gij,gjd->gid"}> : () -> ()
    %cst_5 = arith.constant dense<0.000000e+00> : vector<2x16x32xf32>
    %12 = tpu.matmul %1, %11, %cst_5 {dimension_numbers = #tpu.dot_dimension_numbers<[2], [1], [1], [2], [0, 0, 0, 1, 1, 2], [0], [0]>} : vector<2x16x16xf32>, vector<2x16x32xf32>, vector<2x16x32xf32> -> vector<2x16x32xf32>
    "tpu.trace_stop"() : () -> ()
    %13 = vector.extract_strided_slice %0 {offsets = [1, 0, 0], sizes = [1, 16, 32], strides = [1, 1, 1]} : vector<4x16x32xf32> to vector<1x16x32xf32>
    %14 = vector.shape_cast %13 : vector<1x16x32xf32> to vector<16x32xf32>
    %15 = vector.shape_cast %14 : vector<16x32xf32> to vector<1x16x32xf32>
    %16 = vector.broadcast %15 : vector<1x16x32xf32> to vector<2x16x32xf32>
    %17 = arith.addf %16, %12 : vector<2x16x32xf32>
    "tpu.trace_start"() <{level = 10 : i32, message = "gij,gjd->gid"}> : () -> ()
    %cst_6 = arith.constant dense<0.000000e+00> : vector<2x16x32xf32>
    %18 = tpu.matmul %1, %17, %cst_6 {dimension_numbers = #tpu.dot_dimension_numbers<[2], [1], [1], [2], [0, 0, 0, 1, 1, 2], [0], [0]>} : vector<2x16x16xf32>, vector<2x16x32xf32>, vector<2x16x32xf32> -> vector<2x16x32xf32>
    "tpu.trace_stop"() : () -> ()
    %19 = vector.extract_strided_slice %0 {offsets = [0, 0, 0], sizes = [1, 16, 32], strides = [1, 1, 1]} : vector<4x16x32xf32> to vector<1x16x32xf32>
    %20 = vector.shape_cast %19 : vector<1x16x32xf32> to vector<16x32xf32>
    %21 = vector.shape_cast %20 : vector<16x32xf32> to vector<1x16x32xf32>
    %22 = vector.broadcast %21 : vector<1x16x32xf32> to vector<2x16x32xf32>
    %23 = arith.addf %22, %18 : vector<2x16x32xf32>
    %24 = vector.shape_cast %23 : vector<2x16x32xf32> to vector<1x2x512xf32>
    %c0_7 = arith.constant 0 : index
    %c0_8 = arith.constant 0 : index
    %c0_9 = arith.constant 0 : index
    %25 = vector.load %arg3[%c0_7, %c0_8, %c0_9] : memref<1x2x512xf32, #tpu.memory_space<vmem>>, vector<1x2x512xf32>
    tpu.vector_store %arg3[%c0_7, %c0_8, %c0_9], %24 {strides = array<i32>} : memref<1x2x512xf32, #tpu.memory_space<vmem>>, vector<1x2x512xf32>,
    return
  }
  func.func @transform_0(%arg0: i32) -> (i32, i32, i32) {
    %c0_i32 = arith.constant 0 : i32
    %c0_i32_0 = arith.constant 0 : i32
    %c0_i32_1 = arith.constant 0 : i32
    return %arg0, %c0_i32, %c0_i32_0 : i32, i32, i32
  }
  func.func @transform_1(%arg0: i32) -> (i32, i32, i32) {
    %c0_i32 = arith.constant 0 : i32
    %c0_i32_0 = arith.constant 0 : i32
    %c0_i32_1 = arith.constant 0 : i32
    %c0_i32_2 = arith.constant 0 : i32
    return %c0_i32, %c0_i32_0, %c0_i32_1 : i32, i32, i32
  }
  func.func @transform_2(%arg0: i32) -> (i32, i32, i32) {
    %c0_i32 = arith.constant 0 : i32
    %c0_i32_0 = arith.constant 0 : i32
    %c0_i32_1 = arith.constant 0 : i32
    return %arg0, %c0_i32, %c0_i32_0 : i32, i32, i32
  }
}

</mosaic_0001>

<bundles_post_ra>
// kernel: tpu_custom_call.1
= control target key start
LH: loop header
LB: loop body
LE: loop exit
PB: predicated region body
PF: predicated region fallthrough
CT: control target
= control target key end

     0   :  { %7 = vsyncpa [#allocation3], 0  ;;  %s1468_s0 = inlined_call_operand.hbm [shape: f32[8,16,16], index: 0, kind: input, shape index: {}]   ;;  %s1469_s1 = inlined_call_operand.hbm [shape: f32[4,16,32], index: 1, kind: input, shape index: {}]   ;;  %s1470_s2 = inlined_call_operand.hbm [shape: f32[4,2,512], index: 2, kind: output, shape index: {}]  }
   0x1   :  { %9 = vsyncpa [#allocation3 + $0x1], 0 }
   0x2   :  { %10 = vsyncpa [#allocation6], 0 }
   0x3   :  { %11 = vsyncpa [#allocation4], 0 }
   0x4   :  { %13 = vsyncpa [#allocation4 + $0x1], 0  ;;  %s1247_s9 = smov 0   ;;  %s1249_s10 = smov 0  }
   0x5   :  { %s1251_s11 = smov 0   ;;  %s1253_s12 = smov 0  }
   0x6 LB: > { %s1268_s13 = sadd.s32 4294967295, %s1219_s12   ;;  %s914_s14 = sadd.s32 4294967294, %s1219_s12   ;;  %s1219_s12 = sphi %s1253_s12, %s1489_s12   ;;  %s1215_s11 = sphi %s1251_s11, %s1488_s11   ;;  %s1211_s10 = sphi %s1249_s10, %s1487_s10   ;;  %s1207_s9 = sphi %s1247_s9, %s1486_s9  }
   0x7   : > { %p39_p0 = scmp.ne.s32.totalorder %s1211_s10, %s1207_s9  ;;  %p1471_p1 = scmp.eq.s32.totalorder %s1268_s13, 0 }
   0x8   : > { %p90_p3 = scmp.eq.s32.totalorder %s914_s14, 3  ;;  %p915_p5 = scmp.ge.s32.totalorder %s1219_s12, 1 }
   0x9   : > { %p1277_p4 = por %p1471_p1, %p39_p0  ;;  %p97_p7 = scmp.lt.s32.totalorder %s1219_s12, 5 }
   0xa   : > { %p1282_p6 = por %p90_p3, %p39_p0  ;;  %s1221_s18 = smov [#allocation5]  }
   0xb   : > { %s1474_s15 = scalar_select %p1277_p4, 1, 0 }
   0xc   : > { %s1475_s16 = scalar_select %p1282_p6, 1, 0 }
   0xd   : > { %p1287_p8 = pnand %p915_p5, %p97_p7  ;;  %s109_s19 = sshll.u32 %s1221_s18, 4  ;;  %s110_s19 = int_to_ptr.vmem [resolvable:$true] %s109_s19 }
   0xe   : > { %s1300_s21 = sadd.s32 1, %s1219_s12   ;;  %s26_s22 = sadd.s32 1, %s1215_s11 }
   0xf   : > { %s1476_s17 = scalar_select %p1287_p8, 1, 0 }
  0x10   : > { %p1034_p9 = pneg %p1287_p8  ;;  %s23_s23 = ssub.s32 %s1219_s12, %s1300_s21 }
  0x11   : > { %s1091_s26 = scalar_lea.hbm %s1469_s1, 1024 }
  0x12   : > { %p1295_p10 = pnand %p1034_p9, %p1471_p1  ;;  %p1092_p11 = scmp.ne.s32.totalorder %s1469_s1, %s1091_s26 }
  0x13   : > { %p1098_p3 = scmp.lt.u32.totalorder %s1091_s26, %s1469_s1 }
  0x14   : > { %p1093_p12 = pneg %p1295_p10 }
  0x16   : > { %p1094_p13 = pnand %p1093_p12, %p1092_p11 }
  0x18   : > { %p1095_p0 = pneg %p1094_p13 }
  0x1a   : > { %p1100_p5 = pnand %p1098_p3, %p1095_p0 }
  0x1c   : > { %1103 = shalt.err (!%p1100_p5)
}
  0x1d   : > { %s1104_s3 = scalar_lea.vmem %s110_s19, 1024  ;;  %p1112_p2 = scmp.lt.s32.totalorder %s110_s19, %s110_s19 }
  0x1e   : > { %p1105_p7 = scmp.ne.s32.totalorder %s110_s19, %s1104_s3  ;;  %p1113_p6 = scmp.lt.s32.totalorder %s1104_s3, %s1104_s3 }
  0x20   : > { %p1107_p9 = pnand %p1105_p7, %p1093_p12  ;;  %p1114_p4 = por %p1113_p6, %p1112_p2 }
  0x22   : > { %p1108_p1 = pneg %p1107_p9 }
  0x24   : > { %p1115_p8 = pnand %p1114_p4, %p1108_p1 }
  0x26   : > { %1118 = shalt.err (!%p1115_p8)
}
  0x27   : > { %s1222_s4 = smov 128   ;;  %s1223_s5 = smov 8  }
  0x28   : > { %1037 = dma.hbm_to_vmem [thread:$0]  (!%p1295_p10), %s1469_s1, 1024, %s110_s19, [#allocation6], %s1222_s4, %s1222_s4, %s1223_s5  }
  0x29   : > { %p24_p1 = scmp.eq.s32.totalorder %s23_s23, 0  ;;  %p33_p2 = scmp.ne.s32.totalorder %s1215_s11, %s1211_s10 }
  0x2a   : > { %p34_p4 = scmp.eq.s32.totalorder %s1219_s12, 0  ;;  %p1047_p6 = scmp.lt.s32.totalorder %s1219_s12, 4 }
  0x2b   : > { %s1329_s8 = scalar_select %p24_p1, %s1215_s11, %s26_s22  }
  0x2c   : > { %p35_p8 = por %p34_p4, %p33_p2  ;;  %p1478_p11 = scmp.eq.s32.totalorder %s1268_s13, 3 }
  0x2d   : > { %s123_s18 = sand.u32 1, %s1215_s11   ;;  %s944_s20 = sshll.u32 %s1219_s12, 9 }
  0x2e   : > { %p1333_p12 = por %p1478_p11, %p33_p2  ;;  %s918_s24 = sshll.u32 %s123_s18, 5 }
  0x2f   : > { %s1342_s27 = scalar_lea.hbm %s1468_s0, %s944_s20  ;;  %s127_s19 = scalar_lea.vmem [#allocation2], %s918_s24 }
  0x30   : > { %s135_s22 = sshll.u32 %s127_s19, 4  ;;  %p1344_p10 = pnand %p1047_p6, %p35_p8  ;;  %s1348_s22 = int_to_ptr.vmem [resolvable:$true] %s135_s22 }
  0x31   : > { %s1350_s28 = scalar_lea.sflag [#allocation3], %s123_s18  ;;  %s1119_s29 = scalar_lea.hbm %s1342_s27, 512 }
  0x32   : > { %p1120_p13 = scmp.ne.s32.totalorder %s1342_s27, %s1119_s29  ;;  %p1121_p0 = pneg %p1344_p10 }
  0x33   : > { %s1124_s6 = scalar_lea.hbm %s1468_s0, 2048  ;;  %p1125_p7 = scmp.lt.u32.totalorder %s1342_s27, %s1468_s0 }
  0x34   : > { %p1122_p3 = pnand %p1121_p0, %p1120_p13  ;;  %p1126_p9 = scmp.lt.u32.totalorder %s1124_s6, %s1119_s29 }
  0x35   : > { %p1128_p2 = scmp.lt.u32.totalorder %s1119_s29, %s1342_s27 }
  0x36   : > { %p1123_p5 = pneg %p1122_p3  ;;  %p1127_p1 = por %p1126_p9, %p1125_p7 }
  0x38   : > { %p1129_p4 = por %p1128_p2, %p1127_p1 }
  0x3a   : > { %p1130_p6 = pnand %p1129_p4, %p1123_p5 }
  0x3c   : > { %1133 = shalt.err (!%p1130_p6)
}
  0x3d   : > { %s1134_s18 = scalar_lea.vmem %s1348_s22, 512  ;;  %s1224_s24 = smov [#allocation2]  }
  0x3e   : > { %p1135_p8 = scmp.ne.s32.totalorder %s1348_s22, %s1134_s18  ;;  %s1139_s25 = sshll.u32 %s1224_s24, 4  ;;  %s1140_s25 = int_to_ptr.vmem [resolvable:$false] %s1139_s25 }
  0x3f   : > { %s1141_s26 = scalar_lea.vmem %s1140_s25, 1024  ;;  %p1142_p3 = scmp.lt.s32.totalorder %s1348_s22, %s1140_s25 }
  0x40   : > { %p1137_p11 = pnand %p1135_p8, %p1121_p0  ;;  %p1143_p7 = scmp.lt.s32.totalorder %s1141_s26, %s1134_s18 }
  0x42   : > { %p1138_p13 = pneg %p1137_p11  ;;  %p1144_p9 = por %p1143_p7, %p1142_p3 }
  0x44   : > { %p1145_p1 = pnand %p1144_p9, %p1138_p13 }
  0x46   : > { %1148 = shalt.err (!%p1145_p1)
}
  0x47   : > { %1041 = dma.hbm_to_vmem [thread:$0]  (!%p1344_p10), %s1342_s27, 512, %s1348_s22, %s1350_s28, %s1222_s4, %s1222_s4, %s1223_s5  }
  0x48   : > { %p1481_p0 = scmp.ne.s32.totalorder %s1476_s17, 0 }
  0x49   : > { %s1384_s19 = sand.u32 (!%p1481_p0), 1, %s1211_s10   ;;  %p1482_p5 = scmp.ne.s32.totalorder (!%p1481_p0), %s1474_s15, 0 }
  0x4a   : > { %147 = sbr.rel (%p1481_p0) target bundleno = 916 (0x394), region = 28  ;;  %s923_s29 = sshll.u32 (!%p1481_p0), %s1384_s19, 5 }
  0x4b   : > { %s150_s30 = scalar_lea.sflag (!%p1481_p0), [#allocation3], %s1384_s19  ;;  %s153_s3 = scalar_lea.vmem (!%p1481_p0), [#allocation2], %s923_s29 }
  0x51   : > { %1194 = dma.done.wait (%p1482_p5), %s150_s30, 512  }
  0x52   : > { %1196 = vsyncadd (%p1482_p5), %s150_s30, 4294966784  ;;  %p1483_p2 = scmp.eq.s32.totalorder %s1268_s13, 0 }
  0x54   : > { %1198 = dma.done.wait (%p1483_p2), [#allocation6], 1024   ;;  %p1484_p10 = pmov %p1483_p2 }
  0x55   : > { %vm191_vm0 = vcmask 130048   ;;  %v185_v0 = vld [vmem:[#allocation5 + $0x30] sm:$0xff]  ;;  %v186_v1 = vld [vmem:[#allocation5 + $0x38] sm:$0xff]  ;;  %v187_v2 = vld [vmem:[%s153_s3] sm:$0xff]  ;;  %v1225_v31 = vmov 1983009808   ;;  %v605_v33 = vlaneseq }
  0x56   : > { %1200 = vsyncadd (%p1484_p10), [#allocation6], 4294966272  ;;  %v1006_v3 = vpack.c.bf16 %v186_v1, %v185_v0  ;;  %972 = vmatprep.mubr.msk.f32.mxu0 %vm191_vm0, %v187_v2  ;;  %982 = vmatprep.mubr.msk.f32.mxu1 %vm191_vm0, %v187_v2  ;;  %v188_v4 = vld [vmem:[%s153_s3 + $0x8] sm:$0xff]  ;;  %v189_v5 = vld [vmem:[%s153_s3 + $0x10] sm:$0xff]  ;;  %v603_v32 = vunpack.c.l.s4 %v1225_v31  ;;  %v1226_v38 = vmov 1934713408  }
  0x57   : > { %v190_v6 = vld [vmem:[%s153_s3 + $0x18] sm:$0xff]  ;;  %v184_v7 = vld [vmem:[#allocation5 + $0x28] sm:$0xff]  ;;  %v183_v8 = vld [vmem:[#allocation5 + $0x20] sm:$0xff]  ;;  %v606_v35 = vshrl.u32 %v605_v33, 7  ;;  %v634_v39 = vunpack.c.l.s4 %v1226_v38  ;;  %v1227_v45 = vmov 0.0   ;;  %s1228_s15 = smov 64  }
  0x58   : > { %1007 = vmatprep.subr.bf16.mxu0 %v1006_v3  ;;  %v182_v19 = vld [vmem:[#allocation5 + $0x18] sm:$0xff]  ;;  %v181_v20 = vld [vmem:[#allocation5 + $0x10] sm:$0xff]  ;;  %v604_v34 = vunpack.c.0.s8 %v603_v32  ;;  %v180_v36 = vld [vmem:[#allocation5 + $0x8] sm:$0xff]  ;;  %s1229_s17 = smov 32   ;;  %s1230_s4 = smov 96   ;;  %vm781_vm1 = vcmask 261120  }
  0x59   : > { %1009 = vmatpush3.bf16.msra.mxu0 %v1006_v3  ;;  %v179_v37 = vld [vmem:[#allocation5] sm:$0xff]  ;;  %v635_v47 = vunpack.c.0.s8 %v634_v39  ;;  %vm783_vm2 = vcmask 523264   ;;  %vm785_vm3 = vcmask 785408   ;;  %s925_s5 = sshll.u32 %s1384_s19, 3  ;;  %s945_s27 = sshll.u32 %s1268_s13, 7 }
  0x5a   : > { %v1408_v42 = vsub.s32 %v604_v34, %v606_v35  ;;  %s177_s22 = scalar_lea.vmem [#allocation7], %s925_s5  ;;  %s1425_s7 = scalar_lea.hbm %s1470_s2, %s945_s27 }
  0x5b   : > { %v638_v58 = vsub.s32 %v635_v47, %v606_v35  ;;  %s834_s23 = sshll.u32 %s177_s22, 4  ;;  %s820_s20 = scalar_lea.sflag [#allocation4], %s1384_s19  ;;  %s1427_s23 = int_to_ptr.vmem [resolvable:$true] %s834_s23 }
  0x5c   : > { %973 = vmatmul.mubr.msk.f32.vlgmr.msra.gmra.mrb[0].mxu0 %vm191_vm0, %v188_v4  ;;  %s1149_s13 = scalar_lea.vmem %s1427_s23, 128  ;;  %s1231_s18 = smov [#allocation7]  }
  0x5d   : > { %975 = vmatprep.mubr.msk.f32.mxu0 %vm191_vm0, %v189_v5  ;;  %p1150_p4 = scmp.ne.s32.totalorder %s1427_s23, %s1149_s13  ;;  %s1153_s24 = sshll.u32 %s1231_s18, 4  ;;  %s1154_s24 = int_to_ptr.vmem [resolvable:$false] %s1153_s24 }
  0x5e   : > { %s1155_s25 = scalar_lea.vmem %s1154_s24, 256  ;;  %p1156_p11 = scmp.lt.s32.totalorder %s1427_s23, %s1154_s24 }
  0x5f   : > { %p1151_p6 = pnand %p1150_p4, %p1333_p12  ;;  %p1157_p13 = scmp.lt.s32.totalorder %s1155_s25, %s1149_s13 }
  0x60   : > { %976 = vmatmul.mubr.msk.f32.gmra.mrb[2].mxu0 %vm191_vm0, %v190_v6 }
  0x61   : > { %996 = vmatprep.mubr.msk.f32.mxu0 %vm191_vm0, %v187_v2  ;;  %p1152_p8 = pneg %p1151_p6  ;;  %p1158_p3 = por %p1157_p13, %p1156_p11 }
  0x63   : > { %p1159_p7 = pnand %p1158_p3, %p1152_p8 }
 0x12f   : > { %v974_v9 = vpop.f32.mrb[0].mxu0 }
 0x130   : > { %v290_v10 = vadd.f32 %v974_v9, %v184_v7  ;;  %v270_v11 = vpop.f32.mrb[1].mxu0 }
 0x131   : > { %v289_v12 = vadd.f32 %v270_v11, %v183_v8 }
 0x133   : > { %v977_v13 = vpop.f32.mrb[2].mxu0  ;;  %v1010_v14 = vpack.c.bf16 %v290_v10, %v289_v12 }
 0x134   : > { %v292_v15 = vadd.f32 %v977_v13, %v184_v7  ;;  %v280_v16 = vpop.f32.mrb[3].mxu0 }
 0x135   : > { %v291_v17 = vadd.f32 %v280_v16, %v183_v8  ;;  %1011 = vmatprep.subr.bf16.mxu1 %v1010_v14 }
 0x136   : > { %1013 = vmatpush3.bf16.msra.mxu1 %v1010_v14 }
 0x137   : > { %v1014_v18 = vpack.c.bf16 %v292_v15, %v291_v17 }
 0x139   : > { %983 = vmatmul.mubr.msk.f32.vlgmr.msra.gmra.mrb[0].mxu1 %vm191_vm0, %v188_v4  ;;  %1015 = vmatprep.subr.bf16.mxu1 %v1014_v18 }
 0x13a   : > { %1017 = vmatpush3.bf16.msra.mxu1 %v1014_v18  ;;  %989 = vmatprep.mubr.msk.f32.mxu1 %vm191_vm0, %v189_v5 }
 0x13d   : > { %990 = vmatmul.mubr.msk.f32.vlgmr.msra.gmra.mrb[2].mxu1 %vm191_vm0, %v190_v6 }
 0x13e   : > { %1003 = vmatprep.mubr.msk.f32.mxu1 %vm191_vm0, %v189_v5 }
 0x20c   : > { %v984_v21 = vpop.f32.mrb[0].mxu1 }
 0x20d   : > { %v444_v22 = vadd.f32 %v984_v21, %v182_v19  ;;  %v359_v23 = vpop.f32.mrb[1].mxu1 }
 0x20e   : > { %v443_v24 = vadd.f32 %v359_v23, %v181_v20 }
 0x210   : > { %v1018_v25 = vpack.c.bf16 %v444_v22, %v443_v24  ;;  %v991_v26 = vpop.f32.mrb[2].mxu1 }
 0x211   : > { %v446_v27 = vadd.f32 %v991_v26, %v182_v19  ;;  %v434_v28 = vpop.f32.mrb[3].mxu1 }
 0x212   : > { %v445_v29 = vadd.f32 %v434_v28, %v181_v20  ;;  %1019 = vmatprep.subr.bf16.mxu0 %v1018_v25 }
 0x213   : > { %1021 = vmatpush3.bf16.msra.mxu0 %v1018_v25 }
 0x214   : > { %v1022_v30 = vpack.c.bf16 %v446_v27, %v445_v29 }
 0x216   : > { %1023 = vmatprep.subr.bf16.mxu1 %v1022_v30  ;;  %997 = vmatmul.mubr.msk.f32.vlgmr.msra.gmra.mrb[4].mxu0 %vm191_vm0, %v188_v4 }
 0x217   : > { %1025 = vmatpush3.bf16.msra.mxu1 %v1022_v30 }
 0x21a   : > { %1004 = vmatmul.mubr.msk.f32.vlgmr.msra.gmra.mrb[4].mxu1 %vm191_vm0, %v190_v6 }
 0x2e9   : > { %v998_v40 = vpop.f32.mrb[4].mxu0 }
 0x2ea   : > { %v598_v41 = vadd.f32 %v998_v40, %v180_v36  ;;  %v513_v43 = vpop.f32.mrb[5].mxu0 }
 0x2eb   : > { %v597_v44 = vadd.f32 %v513_v43, %v179_v37 }
 0x2ec   : > { %v667_v46 = vcombine.high %v598_v41, %v1227_v45  ;;  %v674_v50 = vrot.slane %v598_v41, %v1408_v42 }
 0x2ed   : > { %v1005_v48 = vpop.f32.mrb[4].mxu1  ;;  %v601_v49 = vcombine.high %v597_v44, %v1227_v45  ;;  %v608_v53 = vrot.slane %v597_v44, %v1408_v42 }
 0x2ee   : > { %v600_v51 = vadd.f32 %v1005_v48, %v180_v36  ;;  %v588_v52 = vpop.f32.mrb[5].mxu1  ;;  %v681_v55 = vrot.slane %v667_v46, %v1408_v42 }
 0x2ef   : > { %v599_v54 = vadd.f32 %v588_v52, %v179_v37  ;;  %v615_v59 = vrot.slane %v601_v49, %v1408_v42 }
 0x2f0   : > { %v682_v56 = vcombine.high %v600_v51, %v1227_v45  ;;  %v689_v57 = vrot.slane %v600_v51, %v1408_v42 }
 0x2f1   : > { %v616_v60 = vcombine.high %v599_v54, %v1227_v45  ;;  %v623_v61 = vrot.slane %v599_v54, %v1408_v42 }
 0x2f2   : > { %v696_v62 = vrot.slane %v682_v56, %v1408_v42  ;;  %v697_v63 = vcombine.low %v674_v50, %v689_v57  ;;  %v698_v0 = vcombine.high %v674_v50, %v689_v57 }
 0x2f3   : > { %v630_v1 = vrot.slane %v616_v60, %v1408_v42  ;;  %v631_v2 = vcombine.low %v608_v53, %v623_v61  ;;  %v632_v3 = vcombine.high %v608_v53, %v623_v61 }
 0x2f4   : > { %v713_v4 = vcombine.low %v681_v55, %v696_v62  ;;  %v712_v5 = vrot.slane %v698_v0, %v638_v58  ;;  %v705_v6 = vrot.slane %v697_v63, %v638_v58  ;;  %v714_v7 = vcombine.high %v681_v55, %v696_v62 }
 0x2f5   : > { %v647_v8 = vcombine.low %v615_v59, %v630_v1  ;;  %v648_v9 = vcombine.high %v615_v59, %v630_v1  ;;  %v646_v11 = vrot.slane %v632_v3, %v638_v58  ;;  %v639_v12 = vrot.slane %v631_v2, %v638_v58 }
 0x2f6   : > { %762 = vrot.lane.b32.xlu0 %v712_v5, %s1228_s15  ;;  %v729_v10 = vcombine.high %v705_v6, %v1227_v45  ;;  %v728_v13 = vrot.slane %v714_v7, %v638_v58  ;;  %v721_v16 = vrot.slane %v713_v4, %v638_v58  ;;  %v730_v22 = vcombine.high %v712_v5, %v1227_v45 }
 0x2f7   : > { %v663_v14 = vcombine.high %v639_v12, %v1227_v45  ;;  %v662_v15 = vrot.slane %v648_v9, %v638_v58  ;;  %v664_v17 = vcombine.high %v646_v11, %v1227_v45  ;;  %v655_v18 = vrot.slane %v647_v8, %v638_v58 }
 0x2f8   : > { %758 = vrot.lane.b32.xlu1 %v729_v10, %s1229_s17  ;;  %v731_v19 = vcombine.high %v721_v16, %v1227_v45  ;;  %v732_v23 = vcombine.high %v728_v13, %v1227_v45 }
 0x2f9   : > { %v665_v20 = vcombine.high %v655_v18, %v1227_v45  ;;  %v666_v21 = vcombine.high %v662_v15, %v1227_v45 }
 0x2fa   : > { %738 = vrot.lane.b32.xlu0 %v646_v11, %s1228_s15 }
 0x2fc   : > { %774 = vrot.lane.b32.xlu1 %v728_v13, %s1228_s15 }
 0x2fe   : > { %734 = vrot.lane.b32.xlu0 %v663_v14, %s1229_s17 }
 0x300   : > { %750 = vrot.lane.b32.xlu1 %v662_v15, %s1228_s15 }
 0x302   : > { %742 = vrot.lane.b32.xlu0 %v664_v17, %s1230_s4 }
 0x304   : > { %770 = vrot.lane.b32.xlu1 %v731_v19, %s1229_s17 }
 0x306   : > { %746 = vrot.lane.b32.xlu0 %v665_v20, %s1229_s17 }
 0x308   : > { %754 = vrot.lane.b32.xlu1 %v666_v21, %s1230_s4 }
 0x30a   : > { %766 = vrot.lane.b32.xlu0 %v730_v22, %s1230_s4 }
 0x30c   : > { %778 = vrot.lane.b32.xlu1 %v732_v23, %s1230_s4 }
 0x368   : > { %v763_v24 = vpop.permute.xlu0 %762 }
 0x36a   : > { %v759_v25 = vpop.permute.xlu1 %758 }
 0x36b   : > { %v790_v37 = vsel %vm781_vm1, %v705_v6, %v759_v25 }
 0x36c   : > { %v739_v26 = vpop.permute.xlu0 %738  ;;  %v791_v45 = vsel %vm783_vm2, %v790_v37, %v763_v24 }
 0x36e   : > { %v775_v27 = vpop.permute.xlu1 %774 }
 0x370   : > { %v735_v28 = vpop.permute.xlu0 %734 }
 0x371   : > { %v782_v33 = vsel %vm781_vm1, %v639_v12, %v735_v28 }
 0x372   : > { %v751_v29 = vpop.permute.xlu1 %750  ;;  %v784_v40 = vsel %vm783_vm2, %v782_v33, %v739_v26 }
 0x374   : > { %v743_v30 = vpop.permute.xlu0 %742 }
 0x375   : > { %v786_v43 = vsel %vm785_vm3, %v784_v40, %v743_v30 }
 0x376   : > { %v771_v31 = vpop.permute.xlu1 %770 }
 0x377   : > { %v793_v38 = vsel %vm781_vm1, %v721_v16, %v771_v31 }
 0x378   : > { %v747_v32 = vpop.permute.xlu0 %746  ;;  %v794_v46 = vsel %vm783_vm2, %v793_v38, %v775_v27 }
 0x379   : > { %v787_v34 = vsel %vm781_vm1, %v655_v18, %v747_v32 }
 0x37a   : > { %v755_v35 = vpop.permute.xlu1 %754  ;;  %v788_v36 = vsel %vm783_vm2, %v787_v34, %v751_v29 }
 0x37b   : > { %v789_v39 = vsel %vm785_vm3, %v788_v36, %v755_v35 }
 0x37c   : > { %v767_v41 = vpop.permute.xlu0 %766  ;;  %v800_v44 = vcombine.low %v786_v43, %v789_v39 }
 0x37d   : > { %v792_v48 = vsel %vm785_vm3, %v791_v45, %v767_v41 }
 0x37e   : > { %v779_v47 = vpop.permute.xlu1 %778  ;;  %v808_v51 = vrot.slane %v800_v44, %v1408_v42 }
 0x37f   : > { %v795_v49 = vsel %vm785_vm3, %v794_v46, %v779_v47 }
 0x380   : > { %v801_v50 = vcombine.low %v792_v48, %v795_v49 }
 0x382   : > { %v815_v52 = vrot.slane %v801_v50, %v1408_v42 }
 0x384   : > { %v816_v53 = vcombine.low %v808_v51, %v815_v52 }
 0x386   : > { %818 = vst [vmem:[%s177_s22] sm:$0xff] %v816_v53 }
 0x387   : > { %1162 = shalt.err (!%p1159_p7)
}
 0x388   : > { %s1163_s26 = scalar_lea.hbm %s1425_s7, 128  ;;  %s1167_s30 = scalar_lea.hbm %s1470_s2, 512 }
 0x389   : > { %p1164_p9 = scmp.ne.s32.totalorder %s1425_s7, %s1163_s26  ;;  %p1168_p5 = scmp.lt.u32.totalorder %s1425_s7, %s1470_s2 }
 0x38a   : > { %p1169_p2 = scmp.lt.u32.totalorder %s1167_s30, %s1163_s26  ;;  %p1171_p4 = scmp.lt.u32.totalorder %s1163_s26, %s1425_s7 }
 0x38b   : > { %p1165_p1 = pnand %p1164_p9, %p1333_p12 }
 0x38c   : > { %p1170_p10 = por %p1169_p2, %p1168_p5 }
 0x38d   : > { %p1166_p0 = pneg %p1165_p1 }
 0x38e   : > { %p1172_p6 = por %p1171_p4, %p1170_p10 }
 0x390   : > { %p1173_p8 = pnand %p1172_p6, %p1166_p0 }
 0x392   : > { %1176 = shalt.err (!%p1173_p8)
}
 0x393   : > { %1032 = dma.vmem_to_hbm [thread:$0]  (%p1333_p12), %s1427_s23, 128, %s1425_s7, %s820_s20  }
 0x394 PF: > { %p1049_p11 = scmp.ge.s32.totalorder %s1219_s12, 2  ;;  %s846_s17 = sand.u32 1, %s1207_s9  }
 0x395   : > { %p1485_p13 = scmp.ne.s32.totalorder %s1475_s16, 0  ;;  %s847_s4 = scalar_lea.sflag [#allocation4], %s846_s17 }
 0x397   : > { %p1043_p3 = pnand %p1049_p11, %p1485_p13 }
 0x399   : > { %1202 = dma.done.wait (!%p1043_p3), %s847_s4, 128  }
 0x39a   : > { %1204 = vsyncadd (!%p1043_p3), %s847_s4, 4294967168  ;;  %p16_p7 = scmp.ge.s32.totalorder %s1300_s21, 6   ;;  %s1486_s9 = smov %s1211_s10 }
 0x39b   : > { %s1487_s10 = smov %s1215_s11  ;;  %s1488_s11 = smov %s1329_s8 }
 0x39c   : > { %s1489_s12 = smov %s1300_s21  ;;  %18 = sbr.rel (!%p16_p7) target bundleno = 6 (0x6), region = 77 }
 0x3a3   :  { %852 = vsyncpa [#allocation3], 1 }
 0x3a4   :  { %854 = vsyncpa [#allocation3 + $0x1], 1 }
 0x3a5   :  { %855 = vsyncpa [#allocation6], 1 }
 0x3a6   :  { %856 = vsyncpa [#allocation4], 1 }
 0x3a7   :  { %858 = vsyncpa [#allocation4 + $0x1], 1 }

</bundles_post_ra>
